<compile_context>
chip_gen: v7x
topology: tpu7x:2x2x1
jax: 0.10.0
libtpu: 0.0.40
codegen_flags: <defaults>
</compile_context>

<pallas_src>
import jax
import jax.numpy as jnp
from jax.experimental import pallas as pl
from jax.experimental.pallas import tpu as pltpu

LN_EPS = 1e-5  # nn.LayerNorm default


def _round_up(x, m):
    return (x + m - 1) // m * m


def transition_mlp_kernel(state_ref, act_ref, w1s_ref, w1a_ref, b1_ref,
                          w2_ref, b2_ref, g_ref, beta_ref, w3_ref, b3_ref,
                          o_ref):
    state = state_ref[...]                                   # [TB, input_dim] f32
    act = act_ref[...]                                       # [TB, 1] int32
    tb = state.shape[0]
    adim = w1a_ref.shape[0]

    # one_hot(action) @ W1_action == row gather of W1_action; the one-hot is
    # built in-kernel so the concatenated [state | one_hot] never hits HBM.
    lane = jax.lax.broadcasted_iota(jnp.int32, (tb, adim), 1)
    onehot = (lane == act).astype(w1a_ref.dtype)             # exact 0/1 in bf16

    # Linear 1 (split state/action parts) + ReLU: bf16 MXU, f32 accumulation.
    h1 = jnp.dot(state.astype(w1s_ref.dtype), w1s_ref[...],
                 preferred_element_type=jnp.float32)
    h1 = h1 + jnp.dot(onehot, w1a_ref[...],
                      preferred_element_type=jnp.float32)
    h1 = jnp.maximum(h1 + b1_ref[...], 0.0)

    # Linear 2
    h2 = jnp.dot(h1.astype(w2_ref.dtype), w2_ref[...],
                 preferred_element_type=jnp.float32) + b2_ref[...]

    # LayerNorm (population variance, eps=1e-5), single pass, all in f32.
    inv_h = 1.0 / h2.shape[-1]
    mean = jnp.sum(h2, axis=-1, keepdims=True) * inv_h
    mean_sq = jnp.sum(h2 * h2, axis=-1, keepdims=True) * inv_h
    var = mean_sq - mean * mean
    inv_std = jax.lax.rsqrt(var + LN_EPS)                    # EUP
    ln = (h2 - mean) * inv_std * g_ref[...] + beta_ref[...]

    # ReLU + Linear 3
    h3 = jnp.maximum(ln, 0.0)
    out = jnp.dot(h3.astype(w3_ref.dtype), w3_ref[...],
                  preferred_element_type=jnp.float32) + b3_ref[...]
    o_ref[...] = out.astype(o_ref.dtype)


def transition_mlp_pallas(state, action, params, *, block_b=128):
    """state: [B, input_dim] f32, action: [B] int.  Returns [B, input_dim] f32."""
    B, input_dim = state.shape
    w1s, w1a, b1, w2, b2, g, beta, w3, b3 = params

    # Batch tile: multiple of 8 sublanes, up to block_b rows per grid step.
    tb = min(block_b, _round_up(B, 8))
    Bp = _round_up(B, tb)
    if Bp != B:
        state = jnp.pad(state, ((0, Bp - B), (0, 0)))
        action = jnp.pad(action, ((0, Bp - B),))
    act2d = action.astype(jnp.int32).reshape(Bp, 1)
    nb = Bp // tb

    def batch_spec(last):
        return pl.BlockSpec((tb, last), lambda i: (i, 0))

    def const_spec(arr):  # weight stays VMEM-resident across grid steps
        return pl.BlockSpec(arr.shape, lambda i: (0, 0))

    out = pl.pallas_call(
        transition_mlp_kernel,
        out_shape=jax.ShapeDtypeStruct((Bp, input_dim), jnp.float32),
        grid=(nb,),
        in_specs=[
            batch_spec(input_dim),                 # state tile
            batch_spec(1),                         # action ids tile
            const_spec(w1s), const_spec(w1a), const_spec(b1),
            const_spec(w2), const_spec(b2),
            const_spec(g), const_spec(beta),
            const_spec(w3), const_spec(b3),
        ],
        out_specs=batch_spec(input_dim),
        compiler_params=pltpu.CompilerParams(
            dimension_semantics=("parallel",)),
    )(state, act2d, w1s, w1a, b1, w2, b2, g, beta, w3, b3)
    return out[:B]


def init_params(key, input_dim, hidden_dim, action_dim):
    """Synthetic init; shapes match the PyTorch module (weights stored [in, out])."""
    ks = jax.random.split(key, 8)
    w1_full = jax.random.normal(ks[0], (input_dim + action_dim, hidden_dim),
                                jnp.float32) * 0.1
    b1 = jax.random.normal(ks[1], (1, hidden_dim), jnp.float32) * 0.1
    w2 = jax.random.normal(ks[2], (hidden_dim, hidden_dim), jnp.float32) * 0.1
    b2 = jax.random.normal(ks[3], (1, hidden_dim), jnp.float32) * 0.1
    gamma = 1.0 + 0.1 * jax.random.normal(ks[4], (1, hidden_dim), jnp.float32)
    beta = 0.1 * jax.random.normal(ks[5], (1, hidden_dim), jnp.float32)
    w3 = jax.random.normal(ks[6], (hidden_dim, input_dim), jnp.float32) * 0.1
    b3 = jax.random.normal(ks[7], (1, input_dim), jnp.float32) * 0.1
    # MXU operands in bf16; biases / LayerNorm affine params stay f32.
    w1s = w1_full[:input_dim].astype(jnp.bfloat16)     # state part of W1
    w1a = w1_full[input_dim:].astype(jnp.bfloat16)     # action part of W1
    return (w1s, w1a, b1, w2.astype(jnp.bfloat16), b2, gamma, beta,
            w3.astype(jnp.bfloat16), b3)


def reference_forward(state, action, params, action_dim):
    """Mirrors the original module: one-hot + concat, single W1, two-pass LN."""
    w1s, w1a, b1, w2, b2, g, beta, w3, b3 = params
    onehot = jax.nn.one_hot(action, action_dim, dtype=jnp.float32)
    x = jnp.concatenate([state, onehot], axis=-1)
    w1 = jnp.concatenate([w1s, w1a], axis=0)           # original [in+A, hidden]
    h1 = jnp.maximum(jnp.dot(x.astype(jnp.bfloat16), w1,
                             preferred_element_type=jnp.float32) + b1, 0.0)
    h2 = jnp.dot(h1.astype(jnp.bfloat16), w2,
                 preferred_element_type=jnp.float32) + b2
    mean = jnp.mean(h2, axis=-1, keepdims=True)
    var = jnp.mean((h2 - mean) ** 2, axis=-1, keepdims=True)
    ln = (h2 - mean) / jnp.sqrt(var + LN_EPS) * g + beta
    h3 = jnp.maximum(ln, 0.0)
    return jnp.dot(h3.astype(jnp.bfloat16), w3,
                   preferred_element_type=jnp.float32) + b3


if __name__ == "__main__":
    key = jax.random.PRNGKey(0)
    k_state, k_action, k_params = jax.random.split(key, 3)

    batch = 256          # tiled into 2 grid steps of 128 rows
    input_dim = 32
    hidden_dim = 128     # full 128-lane vregs / MXU passes
    action_dim = 4

    state = jax.random.normal(k_state, (batch, input_dim), jnp.float32)
    action = jax.random.randint(k_action, (batch,), 0, action_dim, jnp.int32)
    params = init_params(k_params, input_dim, hidden_dim, action_dim)

    out = transition_mlp_pallas(state, action, params)
    out = jax.block_until_ready(out)

    ref = reference_forward(state, action, params, action_dim)
    assert out.shape == (batch, input_dim)
    assert jnp.allclose(out, ref, atol=1e-2, rtol=1e-2), "mismatch vs JAX reference"

    print("KERNEL_OK")
</pallas_src>

<mosaic_0001>
module attributes {stable_mosaic.version = 11 : i64} {
  func.func @transition_mlp_kernel(%arg0: i32, %arg1: memref<128x32xf32, #tpu.memory_space<vmem>>, %arg2: memref<128x1xi32, #tpu.memory_space<vmem>>, %arg3: memref<32x128xbf16, #tpu.memory_space<vmem>>, %arg4: memref<4x128xbf16, #tpu.memory_space<vmem>>, %arg5: memref<1x128xf32, #tpu.memory_space<vmem>>, %arg6: memref<128x128xbf16, #tpu.memory_space<vmem>>, %arg7: memref<1x128xf32, #tpu.memory_space<vmem>>, %arg8: memref<1x128xf32, #tpu.memory_space<vmem>>, %arg9: memref<1x128xf32, #tpu.memory_space<vmem>>, %arg10: memref<128x32xbf16, #tpu.memory_space<vmem>>, %arg11: memref<1x32xf32, #tpu.memory_space<vmem>>, %arg12: memref<128x32xf32, #tpu.memory_space<vmem>>) attributes {dimension_semantics = [#tpu.dimension_semantics<parallel>], iteration_bounds = array<i64: 2>, scalar_prefetch = 0 : i64, scratch_operands = 0 : i64, tpu.core_type = #tpu.core_type<tc>, window_params = [{transform_indices = @transform_0, window_bounds = array<i64: 128, 32>}, {transform_indices = @transform_1, window_bounds = array<i64: 128, 1>}, {pipeline_mode = #tpu.pipeline_mode<synchronous>, transform_indices = @transform_2, window_bounds = array<i64: 32, 128>}, {pipeline_mode = #tpu.pipeline_mode<synchronous>, transform_indices = @transform_3, window_bounds = array<i64: 4, 128>}, {pipeline_mode = #tpu.pipeline_mode<synchronous>, transform_indices = @transform_4, window_bounds = array<i64: 1, 128>}, {pipeline_mode = #tpu.pipeline_mode<synchronous>, transform_indices = @transform_5, window_bounds = array<i64: 128, 128>}, {pipeline_mode = #tpu.pipeline_mode<synchronous>, transform_indices = @transform_6, window_bounds = array<i64: 1, 128>}, {pipeline_mode = #tpu.pipeline_mode<synchronous>, transform_indices = @transform_7, window_bounds = array<i64: 1, 128>}, {pipeline_mode = #tpu.pipeline_mode<synchronous>, transform_indices = @transform_8, window_bounds = array<i64: 1, 128>}, {pipeline_mode = #tpu.pipeline_mode<synchronous>, transform_indices = @transform_9, window_bounds = array<i64: 128, 32>}, {pipeline_mode = #tpu.pipeline_mode<synchronous>, transform_indices = @transform_10, window_bounds = array<i64: 1, 32>}, {transform_indices = @transform_11, window_bounds = array<i64: 128, 32>}]} {
    %c0 = arith.constant 0 : index
    %c0_0 = arith.constant 0 : index
    %0 = vector.load %arg1[%c0, %c0_0] : memref<128x32xf32, #tpu.memory_space<vmem>>, vector<128x32xf32>
    %c0_1 = arith.constant 0 : index
    %c0_2 = arith.constant 0 : index
    %1 = vector.load %arg2[%c0_1, %c0_2] : memref<128x1xi32, #tpu.memory_space<vmem>>, vector<128x1xi32>
    %2 = tpu.iota {dimensions = array<i32: 1>} : vector<128x4xi32>
    %3 = vector.broadcast %1 : vector<128x1xi32> to vector<128x4xi32>
    %4 = arith.cmpi eq, %2, %3 : vector<128x4xi32>
    %5 = arith.extui %4 : vector<128x4xi1> to vector<128x4xi32>
    %6 = arith.sitofp %5 : vector<128x4xi32> to vector<128x4xf32>
    %7 = arith.truncf %6 : vector<128x4xf32> to vector<128x4xbf16>
    %8 = arith.truncf %0 : vector<128x32xf32> to vector<128x32xbf16>
    %c0_3 = arith.constant 0 : index
    %c0_4 = arith.constant 0 : index
    %9 = vector.load %arg3[%c0_3, %c0_4] : memref<32x128xbf16, #tpu.memory_space<vmem>>, vector<32x128xbf16>
    %cst = arith.constant dense<0.000000e+00> : vector<128x128xf32>
    %10 = tpu.matmul %8, %9, %cst {dimension_numbers = #tpu.dot_dimension_numbers<[1], [0], [0], [1], [0, 0, 1, 1], [], []>} : vector<128x32xbf16>, vector<32x128xbf16>, vector<128x128xf32> -> vector<128x128xf32>
    %c0_5 = arith.constant 0 : index
    %c0_6 = arith.constant 0 : index
    %11 = vector.load %arg4[%c0_5, %c0_6] : memref<4x128xbf16, #tpu.memory_space<vmem>>, vector<4x128xbf16>
    %cst_7 = arith.constant dense<0.000000e+00> : vector<128x128xf32>
    %12 = tpu.matmul %7, %11, %cst_7 {dimension_numbers = #tpu.dot_dimension_numbers<[1], [0], [0], [1], [0, 0, 1, 1], [], []>} : vector<128x4xbf16>, vector<4x128xbf16>, vector<128x128xf32> -> vector<128x128xf32>
    %13 = arith.addf %10, %12 : vector<128x128xf32>
    %c0_8 = arith.constant 0 : index
    %c0_9 = arith.constant 0 : index
    %14 = vector.load %arg5[%c0_8, %c0_9] : memref<1x128xf32, #tpu.memory_space<vmem>>, vector<1x128xf32>
    %15 = vector.broadcast %14 : vector<1x128xf32> to vector<128x128xf32>
    %16 = arith.addf %13, %15 : vector<128x128xf32>
    %cst_10 = arith.constant 0.000000e+00 : f32
    %17 = vector.broadcast %cst_10 : f32 to vector<128x128xf32>
    %18 = arith.maximumf %16, %17 : vector<128x128xf32>
    %19 = arith.truncf %18 : vector<128x128xf32> to vector<128x128xbf16>
    %c0_11 = arith.constant 0 : index
    %c0_12 = arith.constant 0 : index
    %20 = vector.load %arg6[%c0_11, %c0_12] : memref<128x128xbf16, #tpu.memory_space<vmem>>, vector<128x128xbf16>
    %cst_13 = arith.constant dense<0.000000e+00> : vector<128x128xf32>
    %21 = tpu.matmul %19, %20, %cst_13 {dimension_numbers = #tpu.dot_dimension_numbers<[1], [0], [0], [1], [0, 0, 1, 1], [], []>} : vector<128x128xbf16>, vector<128x128xbf16>, vector<128x128xf32> -> vector<128x128xf32>
    %c0_14 = arith.constant 0 : index
    %c0_15 = arith.constant 0 : index
    %22 = vector.load %arg7[%c0_14, %c0_15] : memref<1x128xf32, #tpu.memory_space<vmem>>, vector<1x128xf32>
    %23 = vector.broadcast %22 : vector<1x128xf32> to vector<128x128xf32>
    %24 = arith.addf %21, %23 : vector<128x128xf32>
    %cst_16 = arith.constant dense<0.000000e+00> : vector<128xf32>
    %25 = vector.multi_reduction <add>, %24, %cst_16 [1] : vector<128x128xf32> to vector<128xf32>
    %26 = vector.shape_cast %25 : vector<128xf32> to vector<128x1xf32>
    %cst_17 = arith.constant 7.812500e-03 : f32
    %27 = vector.broadcast %cst_17 : f32 to vector<128x1xf32>
    %28 = arith.mulf %26, %27 : vector<128x1xf32>
    %29 = arith.mulf %24, %24 : vector<128x128xf32>
    %cst_18 = arith.constant dense<0.000000e+00> : vector<128xf32>
    %30 = vector.multi_reduction <add>, %29, %cst_18 [1] : vector<128x128xf32> to vector<128xf32>
    %31 = vector.shape_cast %30 : vector<128xf32> to vector<128x1xf32>
    %cst_19 = arith.constant 7.812500e-03 : f32
    %32 = vector.broadcast %cst_19 : f32 to vector<128x1xf32>
    %33 = arith.mulf %31, %32 : vector<128x1xf32>
    %34 = arith.mulf %28, %28 : vector<128x1xf32>
    %35 = arith.subf %33, %34 : vector<128x1xf32>
    %cst_20 = arith.constant 9.99999974E-6 : f32
    %36 = vector.broadcast %cst_20 : f32 to vector<128x1xf32>
    %37 = arith.addf %35, %36 : vector<128x1xf32>
    %38 = math.rsqrt %37 : vector<128x1xf32>
    %39 = vector.broadcast %28 : vector<128x1xf32> to vector<128x128xf32>
    %40 = arith.subf %24, %39 : vector<128x128xf32>
    %41 = vector.broadcast %38 : vector<128x1xf32> to vector<128x128xf32>
    %42 = arith.mulf %40, %41 : vector<128x128xf32>
    %c0_21 = arith.constant 0 : index
    %c0_22 = arith.constant 0 : index
    %43 = vector.load %arg8[%c0_21, %c0_22] : memref<1x128xf32, #tpu.memory_space<vmem>>, vector<1x128xf32>
    %44 = vector.broadcast %43 : vector<1x128xf32> to vector<128x128xf32>
    %45 = arith.mulf %42, %44 : vector<128x128xf32>
    %c0_23 = arith.constant 0 : index
    %c0_24 = arith.constant 0 : index
    %46 = vector.load %arg9[%c0_23, %c0_24] : memref<1x128xf32, #tpu.memory_space<vmem>>, vector<1x128xf32>
    %47 = vector.broadcast %46 : vector<1x128xf32> to vector<128x128xf32>
    %48 = arith.addf %45, %47 : vector<128x128xf32>
    %cst_25 = arith.constant 0.000000e+00 : f32
    %49 = vector.broadcast %cst_25 : f32 to vector<128x128xf32>
    %50 = arith.maximumf %48, %49 : vector<128x128xf32>
    %51 = arith.truncf %50 : vector<128x128xf32> to vector<128x128xbf16>
    %c0_26 = arith.constant 0 : index
    %c0_27 = arith.constant 0 : index
    %52 = vector.load %arg10[%c0_26, %c0_27] : memref<128x32xbf16, #tpu.memory_space<vmem>>, vector<128x32xbf16>
    %cst_28 = arith.constant dense<0.000000e+00> : vector<128x32xf32>
    %53 = tpu.matmul %51, %52, %cst_28 {dimension_numbers = #tpu.dot_dimension_numbers<[1], [0], [0], [1], [0, 0, 1, 1], [], []>} : vector<128x128xbf16>, vector<128x32xbf16>, vector<128x32xf32> -> vector<128x32xf32>
    %c0_29 = arith.constant 0 : index
    %c0_30 = arith.constant 0 : index
    %54 = vector.load %arg11[%c0_29, %c0_30] : memref<1x32xf32, #tpu.memory_space<vmem>>, vector<1x32xf32>
    %55 = vector.broadcast %54 : vector<1x32xf32> to vector<128x32xf32>
    %56 = arith.addf %53, %55 : vector<128x32xf32>
    %c0_31 = arith.constant 0 : index
    %c0_32 = arith.constant 0 : index
    %57 = vector.load %arg12[%c0_31, %c0_32] : memref<128x32xf32, #tpu.memory_space<vmem>>, vector<128x32xf32>
    tpu.vector_store %arg12[%c0_31, %c0_32], %56 {strides = array<i32>} : memref<128x32xf32, #tpu.memory_space<vmem>>, vector<128x32xf32>,
    return
  }
  func.func @transform_0(%arg0: i32) -> (i32, i32) {
    %c0_i32 = arith.constant 0 : i32
    %c0_i32_0 = arith.constant 0 : i32
    return %arg0, %c0_i32 : i32, i32
  }
  func.func @transform_1(%arg0: i32) -> (i32, i32) {
    %c0_i32 = arith.constant 0 : i32
    %c0_i32_0 = arith.constant 0 : i32
    return %arg0, %c0_i32 : i32, i32
  }
  func.func @transform_2(%arg0: i32) -> (i32, i32) {
    %c0_i32 = arith.constant 0 : i32
    %c0_i32_0 = arith.constant 0 : i32
    %c0_i32_1 = arith.constant 0 : i32
    return %c0_i32, %c0_i32_0 : i32, i32
  }
  func.func @transform_3(%arg0: i32) -> (i32, i32) {
    %c0_i32 = arith.constant 0 : i32
    %c0_i32_0 = arith.constant 0 : i32
    %c0_i32_1 = arith.constant 0 : i32
    return %c0_i32, %c0_i32_0 : i32, i32
  }
  func.func @transform_4(%arg0: i32) -> (i32, i32) {
    %c0_i32 = arith.constant 0 : i32
    %c0_i32_0 = arith.constant 0 : i32
    %c0_i32_1 = arith.constant 0 : i32
    return %c0_i32, %c0_i32_0 : i32, i32
  }
  func.func @transform_5(%arg0: i32) -> (i32, i32) {
    %c0_i32 = arith.constant 0 : i32
    %c0_i32_0 = arith.constant 0 : i32
    %c0_i32_1 = arith.constant 0 : i32
    return %c0_i32, %c0_i32_0 : i32, i32
  }
  func.func @transform_6(%arg0: i32) -> (i32, i32) {
    %c0_i32 = arith.constant 0 : i32
    %c0_i32_0 = arith.constant 0 : i32
    %c0_i32_1 = arith.constant 0 : i32
    return %c0_i32, %c0_i32_0 : i32, i32
  }
  func.func @transform_7(%arg0: i32) -> (i32, i32) {
    %c0_i32 = arith.constant 0 : i32
    %c0_i32_0 = arith.constant 0 : i32
    %c0_i32_1 = arith.constant 0 : i32
    return %c0_i32, %c0_i32_0 : i32, i32
  }
  func.func @transform_8(%arg0: i32) -> (i32, i32) {
    %c0_i32 = arith.constant 0 : i32
    %c0_i32_0 = arith.constant 0 : i32
    %c0_i32_1 = arith.constant 0 : i32
    return %c0_i32, %c0_i32_0 : i32, i32
  }
  func.func @transform_9(%arg0: i32) -> (i32, i32) {
    %c0_i32 = arith.constant 0 : i32
    %c0_i32_0 = arith.constant 0 : i32
    %c0_i32_1 = arith.constant 0 : i32
    return %c0_i32, %c0_i32_0 : i32, i32
  }
  func.func @transform_10(%arg0: i32) -> (i32, i32) {
    %c0_i32 = arith.constant 0 : i32
    %c0_i32_0 = arith.constant 0 : i32
    %c0_i32_1 = arith.constant 0 : i32
    return %c0_i32, %c0_i32_0 : i32, i32
  }
  func.func @transform_11(%arg0: i32) -> (i32, i32) {
    %c0_i32 = arith.constant 0 : i32
    %c0_i32_0 = arith.constant 0 : i32
    return %arg0, %c0_i32 : i32, i32
  }
}

</mosaic_0001>

<bundles_post_ra>
// kernel: tpu_custom_call.1
= control target key start
LH: loop header
LB: loop body
LE: loop exit
PB: predicated region body
PF: predicated region fallthrough
CT: control target
= control target key end

     0   :  { %s1955_s17 = smov 0   ;;  %s2366_s0 = inlined_call_operand.vmem [shape: f32[256,32], index: 0, kind: input, shape index: {}]   ;;  %s2367_s1 = inlined_call_operand.vmem [shape: s32[256,1], index: 1, kind: input, shape index: {}]   ;;  %s2368_s2 = inlined_call_operand.vmem [shape: bf16[32,128], index: 2, kind: input, shape index: {}]   ;;  %s2369_s3 = inlined_call_operand.vmem [shape: bf16[4,128], index: 3, kind: input, shape index: {}]   ;;  %s2370_s4 = inlined_call_operand.vmem [shape: f32[1,128], index: 4, kind: input, shape index: {}]   ;;  %s2371_s5 = inlined_call_operand.vmem [shape: bf16[128,128], index: 5, kind: input, shape index: {}]   ;;  %s2372_s6 = inlined_call_operand.vmem [shape: f32[1,128], index: 6, kind: input, shape index: {}]   ;;  %s2373_s7 = inlined_call_operand.vmem [shape: f32[1,128], index: 7, kind: input, shape index: {}]   ;;  %s2374_s8 = inlined_call_operand.vmem [shape: f32[1,128], index: 8, kind: input, shape index: {}]   ;;  %s2375_s9 = inlined_call_operand.vmem [shape: bf16[128,32], index: 9, kind: input, shape index: {}]   ;;  %s2376_s10 = inlined_call_operand.vmem [shape: f32[1,32], index: 10, kind: input, shape index: {}]   ;;  %s2377_s11 = inlined_call_operand.vmem [shape: f32[256,32], index: 11, kind: output, shape index: {}]  }
   0x1 LB: > { %s1569_s18 = sadd.s32 4294967295, %s1891_s17   ;;  %p1573_p0 = scmp.ge.s32.totalorder %s1891_s17, 1  ;;  %s1891_s17 = sphi %s1955_s17, %s21_s17  }
   0x2   : > { %p349_p1 = scmp.lt.s32.totalorder %s1891_s17, 3 }
   0x4   : > { %p350_p2 = pnand %p1573_p0, %p349_p1 }
   0x5   : > { %s1574_s19 = sshll.u32 (!%p350_p2), %s1569_s18, 4  ;;  %v1893_v0 = vmov (!%p350_p2), 0   ;;  %v563_v6 = vld [vmem:[%s2369_s3] sm:$0x3] (!%p350_p2)  ;;  %vm589_vm0 = vcmask (!%p350_p2), 1041408   ;;  %v1838_v21 = vld [vmem:[%s2371_s5 + $0x8] sm:$0xff] (!%p350_p2)   ;;  %v445_v26 = vlaneseq (!%p350_p2) }
   0x6   : > { %353 = sbr.rel (%p350_p2) target bundleno = 1075 (0x433), region = 64  ;;  %1834 = vset.pattern.permute.xlu1 (!%p350_p2), %v1893_v0  ;;  %1833 = vset.pattern.permute.xlu0 (!%p350_p2), %v1893_v0  ;;  %p395_p3 = scmp.lt.s32.totalorder (!%p350_p2), %s1574_s19, 31  ;;  %v591_v8 = vsel (!%p350_p2), %vm589_vm0, %v563_v6, 0  ;;  %v1985_v11 = vld [vmem:[%s2368_s2] sm:$0xff] (!%p350_p2)   ;;  %v1839_v22 = vld [vmem:[%s2371_s5 + $0x10] sm:$0xff] (!%p350_p2)   ;;  %v1840_v23 = vld [vmem:[%s2371_s5 + $0x18] sm:$0xff] (!%p350_p2)  }
   0x7   : > { %1822 = vmatprep.subr.msk.bf16.mxu0 (!%p350_p2), %vm589_vm0, %v563_v6  ;;  %v1837_v20 = vld [vmem:[%s2371_s5] sm:$0xff] (!%p350_p2)   ;;  %v1842_v25 = vld [vmem:[%s2371_s5 + $0x28] sm:$0xff] (!%p350_p2)   ;;  %v2014_v27 = vand.u32 (!%p350_p2), 127, %v445_v26  ;;  %vm564_vm5 = vcmask (!%p350_p2), 31744   ;;  %v1894_v32 = vmov (!%p350_p2), 0.0  }
   0x8   : > { %1689 = vmatpush3.bf16.msra.mxu0 (!%p350_p2), %v591_v8  ;;  %1726 = vmatprep.subr.bf16.mxu1 (!%p350_p2), %v1837_v20  ;;  %v1841_v24 = vld [vmem:[%s2371_s5 + $0x20] sm:$0xff] (!%p350_p2)   ;;  %v1836_v41 = vld [vmem:[%s2368_s2 + $0x8] sm:$0xff] (!%p350_p2)  }
   0x9   : > { %1706 = vmatprep.subr.bf16.mxu0 (!%p350_p2), %v1985_v11  ;;  %1727 = vmatpush3.bf16.msra.mxu1 (!%p350_p2), %v1837_v20 }
   0xa   : > { %1728 = vmatprep.subr.bf16.mxu1 (!%p350_p2), %v1838_v21 }
   0xd   : > { %s2379_s19 = smov (!%p395_p3, %s1574_s19), 31  ;;  %1729 = vmatpush3.bf16.msra.mxu1 %v1838_v21 }
   0xe   : > { %s1963_s20 = sshll.u32 %s2379_s19, 3  ;;  %1730 = vmatprep.subr.bf16.mxu1 %v1839_v22 }
   0xf   : > { %s1969_s23 = scalar_lea.vmem %s2367_s1, %s1963_s20  ;;  %s2041_s27 = scalar_lea.vmem %s2366_s0, %s1963_s20 }
  0x10   : > { %v431_v1 = vld [vmem:[%s1969_s23 + $0x10] sm:$0xff]  ;;  %v429_v2 = vld [vmem:[%s1969_s23] sm:$0xff]  ;;  %v432_v3 = vld [vmem:[%s1969_s23 + $0x18] sm:$0xff]  ;;  %s2329_s26 = scalar_lea.vmem %s2377_s11, %s1963_s20 }
  0x11   : > { %454 = vperm.xlu1 %1834, %v431_v1   ;;  %448 = vperm.xlu0 %1833, %v429_v2   ;;  %v430_v4 = vld [vmem:[%s1969_s23 + $0x8] sm:$0xff]  ;;  %v433_v7 = vld [vmem:[%s1969_s23 + $0x20] sm:$0xff]  ;;  %v436_v9 = vld [vmem:[%s1969_s23 + $0x38] sm:$0xff] }
  0x12   : > { %v434_v5 = vld [vmem:[%s1969_s23 + $0x28] sm:$0xff]  ;;  %v435_v10 = vld [vmem:[%s1969_s23 + $0x30] sm:$0xff]  ;;  %v437_v13 = vld [vmem:[%s1969_s23 + $0x40] sm:$0xff]  ;;  %1731 = vmatpush3.bf16.msra.mxu1 %v1839_v22 }
  0x13   : > { %v438_v12 = vld [vmem:[%s1969_s23 + $0x48] sm:$0xff]  ;;  %v440_v14 = vld [vmem:[%s1969_s23 + $0x58] sm:$0xff]  ;;  %v439_v15 = vld [vmem:[%s1969_s23 + $0x50] sm:$0xff]  ;;  %1732 = vmatprep.subr.bf16.mxu1 %v1840_v23 }
  0x14   : > { %v442_v16 = vld [vmem:[%s1969_s23 + $0x68] sm:$0xff]  ;;  %v441_v17 = vld [vmem:[%s1969_s23 + $0x60] sm:$0xff]  ;;  %v444_v18 = vld [vmem:[%s1969_s23 + $0x78] sm:$0xff] }
  0x15   : > { %457 = vperm.xlu1 %1834, %v432_v3   ;;  %451 = vperm.xlu0 %1833, %v430_v4   ;;  %v443_v19 = vld [vmem:[%s1969_s23 + $0x70] sm:$0xff]  ;;  %v413_v3 = vld [vmem:[%s2041_s27] sm:$0xff]  ;;  %v414_v4 = vld [vmem:[%s2041_s27 + $0x8] sm:$0xff] }
  0x16   : > { %1733 = vmatpush3.bf16.msra.mxu1 %v1840_v23  ;;  %v551_v8 = vpack.c.bf16 %v414_v4, %v413_v3  ;;  %v423_v21 = vld [vmem:[%s2041_s27 + $0x50] sm:$0xff]  ;;  %v424_v22 = vld [vmem:[%s2041_s27 + $0x58] sm:$0xff]  ;;  %v425_v23 = vld [vmem:[%s2041_s27 + $0x60] sm:$0xff] }
  0x17   : > { %1734 = vmatprep.subr.bf16.mxu1 %v1841_v24 }
  0x19   : > { %463 = vperm.xlu1 %1834, %v434_v5   ;;  %460 = vperm.xlu0 %1833, %v433_v7  }
  0x1a   : > { %1735 = vmatpush3.bf16.msra.mxu1 %v1841_v24  ;;  %v426_v24 = vld [vmem:[%s2041_s27 + $0x68] sm:$0xff] }
  0x1b   : > { %1736 = vmatprep.subr.bf16.mxu1 %v1842_v25  ;;  %v557_v26 = vpack.c.bf16 %v426_v24, %v425_v23 }
  0x1d   : > { %469 = vperm.xlu1 %1834, %v436_v9   ;;  %466 = vperm.xlu0 %1833, %v435_v10   ;;  %v415_v9 = vld [vmem:[%s2041_s27 + $0x10] sm:$0xff]  ;;  %v416_v10 = vld [vmem:[%s2041_s27 + $0x18] sm:$0xff] }
  0x1e   : > { %1737 = vmatpush3.bf16.msra.mxu1 %v1842_v25  ;;  %v556_v25 = vpack.c.bf16 %v424_v22, %v423_v21 }
  0x21   : > { %475 = vperm.xlu1 %1834, %v438_v12   ;;  %472 = vperm.xlu0 %1833, %v437_v13   ;;  %v418_v12 = vld [vmem:[%s2041_s27 + $0x28] sm:$0xff]  ;;  %v552_v13 = vpack.c.bf16 %v416_v10, %v415_v9 }
  0x25   : > { %481 = vperm.xlu1 %1834, %v440_v14   ;;  %478 = vperm.xlu0 %1833, %v439_v15   ;;  %v419_v15 = vld [vmem:[%s2041_s27 + $0x30] sm:$0xff] }
  0x29   : > { %487 = vperm.xlu1 %1834, %v442_v16   ;;  %484 = vperm.xlu0 %1833, %v441_v17   ;;  %v420_v16 = vld [vmem:[%s2041_s27 + $0x38] sm:$0xff]  ;;  %v421_v17 = vld [vmem:[%s2041_s27 + $0x40] sm:$0xff] }
  0x2d   : > { %493 = vperm.xlu1 %1834, %v444_v18   ;;  %490 = vperm.xlu0 %1833, %v443_v19   ;;  %v422_v18 = vld [vmem:[%s2041_s27 + $0x48] sm:$0xff]  ;;  %v554_v19 = vpack.c.bf16 %v420_v16, %v419_v15 }
  0x2e   : > { %v555_v20 = vpack.c.bf16 %v422_v18, %v421_v17 }
  0x90   : > { %v455_v28 = vpop.permute.xlu1 %454  ;;  %v449_v29 = vpop.permute.xlu0 %448 }
  0x91   : > { %vm497_vm1 = vcmp.eq.s32.totalorder %v2014_v27, %v455_v28  ;;  %vm495_vm2 = vcmp.eq.s32.totalorder %v2014_v27, %v449_v29  ;;  %v428_v28 = vld [vmem:[%s2041_s27 + $0x78] sm:$0xff] }
  0x92   : > { %v1582_v33 = vsel %vm497_vm1, 1.0, %v1894_v32  ;;  %v1580_v34 = vsel %vm495_vm2, 1.0, %v1894_v32  ;;  %vm702_vm2 = vcmask 261120  }
  0x94   : > { %v458_v30 = vpop.permute.xlu1 %457  ;;  %v452_v31 = vpop.permute.xlu0 %451 }
  0x95   : > { %vm498_vm3 = vcmp.eq.s32.totalorder %v2014_v27, %v458_v30  ;;  %vm496_vm4 = vcmp.eq.s32.totalorder %v2014_v27, %v452_v31  ;;  %v1843_v30 = vld [vmem:[%s2371_s5 + $0x30] sm:$0xff]   ;;  %v1844_v31 = vld [vmem:[%s2371_s5 + $0x38] sm:$0xff]  }
  0x96   : > { %v1583_v35 = vsel %vm498_vm3, 1.0, %v1894_v32  ;;  %v1581_v36 = vsel %vm496_vm4, 1.0, %v1894_v32  ;;  %1738 = vmatprep.subr.bf16.mxu1 %v1843_v30 }
  0x97   : > { %v544_v37 = vpack.c.bf16 %v1583_v35, %v1582_v33  ;;  %v543_v38 = vpack.c.bf16 %v1581_v36, %v1580_v34  ;;  %1739 = vmatpush3.bf16.msra.mxu1 %v1843_v30 }
  0x98   : > { %v464_v39 = vpop.permute.xlu1 %463  ;;  %v461_v40 = vpop.permute.xlu0 %460  ;;  %1740 = vmatprep.subr.bf16.mxu1 %v1844_v31 }
  0x99   : > { %vm500_vm6 = vcmp.eq.s32.totalorder %v2014_v27, %v464_v39  ;;  %vm499_vm7 = vcmp.eq.s32.totalorder %v2014_v27, %v461_v40  ;;  %1690 = vmatprep.mubr.msk.bf16.mxu0 %vm564_vm5, %v543_v38 }
  0x9a   : > { %v1585_v42 = vsel %vm500_vm6, 1.0, %v1894_v32  ;;  %v1584_v43 = vsel %vm499_vm7, 1.0, %v1894_v32  ;;  %1691 = vmatmul.mubr.msk.bf16.vlgmr.msra.gmra.mrb[0].mxu0 %vm564_vm5, %v544_v37 }
  0x9b   : > { %v545_v44 = vpack.c.bf16 %v1585_v42, %v1584_v43  ;;  %1707 = vmatpush3.bf16.msra.mxu0 %v1985_v11  ;;  %v417_v11 = vld [vmem:[%s2041_s27 + $0x20] sm:$0xff]  ;;  %1741 = vmatpush3.bf16.msra.mxu1 %v1844_v31 }
  0x9c   : > { %v470_v45 = vpop.permute.xlu1 %469  ;;  %v467_v46 = vpop.permute.xlu0 %466  ;;  %1708 = vmatprep.subr.bf16.mxu0 %v1836_v41  ;;  %v553_v14 = vpack.c.bf16 %v418_v12, %v417_v11 }
  0x9d   : > { %vm502_vm8 = vcmp.eq.s32.totalorder %v2014_v27, %v470_v45  ;;  %vm501_vm9 = vcmp.eq.s32.totalorder %v2014_v27, %v467_v46  ;;  %1694 = vmatprep.mubr.msk.bf16.mxu0 %vm564_vm5, %v545_v44 }
  0x9e   : > { %v1587_v47 = vsel %vm502_vm8, 1.0, %v1894_v32  ;;  %v1586_v48 = vsel %vm501_vm9, 1.0, %v1894_v32 }
  0x9f   : > { %v546_v49 = vpack.c.bf16 %v1587_v47, %v1586_v48  ;;  %1709 = vmatpush3.bf16.msra.mxu0 %v1836_v41 }
  0xa0   : > { %v476_v50 = vpop.permute.xlu1 %475  ;;  %v473_v51 = vpop.permute.xlu0 %472 }
  0xa1   : > { %vm504_vm10 = vcmp.eq.s32.totalorder %v2014_v27, %v476_v50  ;;  %vm503_vm11 = vcmp.eq.s32.totalorder %v2014_v27, %v473_v51 }
  0xa2   : > { %v1589_v52 = vsel %vm504_vm10, 1.0, %v1894_v32  ;;  %v1588_v53 = vsel %vm503_vm11, 1.0, %v1894_v32  ;;  %1695 = vmatmul.mubr.msk.bf16.gmra.mrb[4].mxu0 %vm564_vm5, %v546_v49 }
  0xa3   : > { %v547_v54 = vpack.c.bf16 %v1589_v52, %v1588_v53 }
  0xa4   : > { %v482_v55 = vpop.permute.xlu1 %481  ;;  %v479_v56 = vpop.permute.xlu0 %478 }
  0xa5   : > { %vm506_vm12 = vcmp.eq.s32.totalorder %v2014_v27, %v482_v55  ;;  %vm505_vm13 = vcmp.eq.s32.totalorder %v2014_v27, %v479_v56  ;;  %1698 = vmatprep.mubr.msk.bf16.mxu0 %vm564_vm5, %v547_v54 }
  0xa6   : > { %v1591_v57 = vsel %vm506_vm12, 1.0, %v1894_v32  ;;  %v1590_v58 = vsel %vm505_vm13, 1.0, %v1894_v32 }
  0xa7   : > { %v548_v59 = vpack.c.bf16 %v1591_v57, %v1590_v58 }
  0xa8   : > { %v488_v60 = vpop.permute.xlu1 %487  ;;  %v485_v61 = vpop.permute.xlu0 %484 }
  0xa9   : > { %vm508_vm14 = vcmp.eq.s32.totalorder %v2014_v27, %v488_v60  ;;  %vm507_vm15 = vcmp.eq.s32.totalorder %v2014_v27, %v485_v61 }
  0xaa   : > { %v1593_v62 = vsel %vm508_vm14, 1.0, %v1894_v32  ;;  %v1592_v63 = vsel %vm507_vm15, 1.0, %v1894_v32  ;;  %1699 = vmatmul.mubr.msk.bf16.gmra.mrb[8].mxu0 %vm564_vm5, %v548_v59 }
  0xab   : > { %v549_v0 = vpack.c.bf16 %v1593_v62, %v1592_v63 }
  0xac   : > { %v494_v1 = vpop.permute.xlu1 %493  ;;  %v491_v2 = vpop.permute.xlu0 %490 }
  0xad   : > { %vm510_vm0 = vcmp.eq.s32.totalorder %v2014_v27, %v494_v1  ;;  %vm509_vm1 = vcmp.eq.s32.totalorder %v2014_v27, %v491_v2  ;;  %1702 = vmatprep.mubr.msk.bf16.mxu0 %vm564_vm5, %v549_v0  ;;  %v427_v27 = vld [vmem:[%s2041_s27 + $0x70] sm:$0xff] }
  0xae   : > { %v1595_v5 = vsel %vm510_vm0, 1.0, %v1894_v32  ;;  %v1594_v6 = vsel %vm509_vm1, 1.0, %v1894_v32  ;;  %v558_v29 = vpack.c.bf16 %v428_v28, %v427_v27  ;;  %v1614_v32 = vld [vmem:[%s2370_s4] ss:$0 sm:$0xff] }
  0xaf   : > { %v550_v7 = vpack.c.bf16 %v1595_v5, %v1594_v6 }
  0xb2   : > { %1703 = vmatmul.mubr.msk.bf16.gmra.mrb[12].mxu0 %vm564_vm5, %v550_v7 }
  0xb3   : > { %1710 = vmatprep.mubr.msk.bf16.mxu0 %vm702_vm2, %v551_v8 }
  0xba   : > { %1711 = vmatmul.mubr.msk.bf16.vlgmr.msra.gmra.mrb[0].mxu0 %vm702_vm2, %v552_v13 }
  0xbb   : > { %1714 = vmatprep.mubr.msk.bf16.mxu0 %vm702_vm2, %v553_v14 }
  0xc2   : > { %1715 = vmatmul.mubr.msk.bf16.gmra.mrb[4].mxu0 %vm702_vm2, %v554_v19 }
  0xc3   : > { %1718 = vmatprep.mubr.msk.bf16.mxu0 %vm702_vm2, %v555_v20 }
  0xca   : > { %1719 = vmatmul.mubr.msk.bf16.gmra.mrb[8].mxu0 %vm702_vm2, %v556_v25  ;;  %v2086_v25 = vld [vmem:[%s2372_s6] ss:$0 sm:$0xff] }
  0xcb   : > { %1722 = vmatprep.mubr.msk.bf16.mxu0 %vm702_vm2, %v557_v26 }
  0xd2   : > { %1723 = vmatmul.mubr.msk.bf16.gmra.mrb[12].mxu0 %vm702_vm2, %v558_v29 }
 0x18d   : > { %v1712_v33 = vpop.f32.mrb[0].mxu0 }
 0x18e   : > { %v833_v34 = vadd.f32 %v1712_v33, %v1614_v32  ;;  %v761_v35 = vpop.f32.mrb[1].mxu0 }
 0x18f   : > { %v831_v36 = vadd.f32 %v1614_v32, %v761_v35  ;;  %v1713_v37 = vpop.f32.mrb[2].mxu0 }
 0x190   : > { %v834_v38 = vadd.f32 %v1713_v37, %v1614_v32  ;;  %v764_v39 = vpop.f32.mrb[3].mxu0  ;;  %v849_v41 = vmax.f32 %v833_v34, 0.0 }
 0x191   : > { %v832_v40 = vadd.f32 %v1614_v32, %v764_v39  ;;  %v847_v43 = vmax.f32 %v831_v36, 0.0 }
 0x192   : > { %v850_v42 = vmax.f32 %v834_v38, 0.0 }
 0x193   : > { %v848_v44 = vmax.f32 %v832_v40, 0.0 }
 0x194   : > { %v864_v45 = vpack.c.bf16 %v850_v42, %v849_v41 }
 0x195   : > { %v1716_v46 = vpop.f32.mrb[4].mxu0  ;;  %v863_v47 = vpack.c.bf16 %v848_v44, %v847_v43 }
 0x196   : > { %v837_v48 = vadd.f32 %v1716_v46, %v1614_v32  ;;  %v777_v49 = vpop.f32.mrb[5].mxu0 }
 0x197   : > { %v835_v50 = vadd.f32 %v1614_v32, %v777_v49  ;;  %v1717_v51 = vpop.f32.mrb[6].mxu0  ;;  %1742 = vmatprep.mubr.bf16.mxu1 %v863_v47 }
 0x198   : > { %v838_v52 = vadd.f32 %v1717_v51, %v1614_v32  ;;  %v780_v53 = vpop.f32.mrb[7].mxu0  ;;  %1743 = vmatmul.mubr.bf16.vlgmr.msra.gmra.mrb[0].mxu1 %v864_v45  ;;  %v853_v55 = vmax.f32 %v837_v48, 0.0 }
 0x199   : > { %v836_v54 = vadd.f32 %v1614_v32, %v780_v53  ;;  %v851_v57 = vmax.f32 %v835_v50, 0.0  ;;  %v1845_v53 = vld [vmem:[%s2375_s9] sm:$0xff]  }
 0x19a   : > { %v854_v56 = vmax.f32 %v838_v52, 0.0  ;;  %1758 = vmatprep.subr.bf16.mxu0 %v1845_v53  ;;  %1790 = vmatprep.subr.bf16.mxu1 %v1845_v53 }
 0x19b   : > { %v852_v58 = vmax.f32 %v836_v54, 0.0  ;;  %1759 = vmatpush3.bf16.msra.mxu0 %v1845_v53  ;;  %1798 = vmatpush3.bf16.msra.mxu1 %v1845_v53 }
 0x19c   : > { %v866_v59 = vpack.c.bf16 %v854_v56, %v853_v55 }
 0x19d   : > { %v865_v60 = vpack.c.bf16 %v852_v58, %v851_v57  ;;  %v1720_v61 = vpop.f32.mrb[8].mxu0  ;;  %v1846_v58 = vld [vmem:[%s2375_s9 + $0x8] sm:$0xff]  }
 0x19e   : > { %v841_v62 = vadd.f32 %v1720_v61, %v1614_v32  ;;  %v793_v63 = vpop.f32.mrb[9].mxu0  ;;  %1760 = vmatprep.subr.bf16.mxu0 %v1846_v58  ;;  %1791 = vmatprep.subr.bf16.mxu1 %v1846_v58  ;;  %v1847_v61 = vld [vmem:[%s2375_s9 + $0x10] sm:$0xff]  }
 0x19f   : > { %v839_v0 = vadd.f32 %v1614_v32, %v793_v63  ;;  %v1721_v1 = vpop.f32.mrb[10].mxu0  ;;  %1746 = vmatprep.mubr.bf16.mxu1 %v865_v60  ;;  %1761 = vmatpush3.bf16.msra.mxu0 %v1846_v58 }
 0x1a0   : > { %v842_v2 = vadd.f32 %v1721_v1, %v1614_v32  ;;  %v796_v3 = vpop.f32.mrb[11].mxu0  ;;  %1747 = vmatmul.mubr.bf16.gmra.mrb[4].mxu1 %v866_v59  ;;  %v857_v5 = vmax.f32 %v841_v62, 0.0  ;;  %1762 = vmatprep.subr.bf16.mxu0 %v1847_v61 }
 0x1a1   : > { %v840_v4 = vadd.f32 %v1614_v32, %v796_v3  ;;  %v855_v7 = vmax.f32 %v839_v0, 0.0  ;;  %1799 = vmatpush3.bf16.msra.mxu1 %v1846_v58  ;;  %v1848_v0 = vld [vmem:[%s2375_s9 + $0x18] sm:$0xff]   ;;  %v1849_v3 = vld [vmem:[%s2375_s9 + $0x20] sm:$0xff]  }
 0x1a2   : > { %v858_v6 = vmax.f32 %v842_v2, 0.0  ;;  %1792 = vmatprep.subr.bf16.mxu1 %v1847_v61 }
 0x1a3   : > { %v856_v8 = vmax.f32 %v840_v4, 0.0  ;;  %1763 = vmatpush3.bf16.msra.mxu0 %v1847_v61 }
 0x1a4   : > { %v868_v9 = vpack.c.bf16 %v858_v6, %v857_v5  ;;  %1764 = vmatprep.subr.bf16.mxu0 %v1848_v0  ;;  %v1850_v6 = vld [vmem:[%s2375_s9 + $0x28] sm:$0xff]  }
 0x1a5   : > { %v867_v10 = vpack.c.bf16 %v856_v8, %v855_v7  ;;  %v1724_v11 = vpop.f32.mrb[12].mxu0  ;;  %1800 = vmatpush3.bf16.msra.mxu1 %v1847_v61 }
 0x1a6   : > { %v845_v12 = vadd.f32 %v1724_v11, %v1614_v32  ;;  %v809_v13 = vpop.f32.mrb[13].mxu0  ;;  %1793 = vmatprep.subr.bf16.mxu1 %v1848_v0 }
 0x1a7   : > { %v843_v14 = vadd.f32 %v1614_v32, %v809_v13  ;;  %v1725_v15 = vpop.f32.mrb[14].mxu0  ;;  %1750 = vmatprep.mubr.bf16.mxu1 %v867_v10  ;;  %1765 = vmatpush3.bf16.msra.mxu0 %v1848_v0 }
 0x1a8   : > { %v846_v16 = vadd.f32 %v1725_v15, %v1614_v32  ;;  %v812_v17 = vpop.f32.mrb[15].mxu0  ;;  %1751 = vmatmul.mubr.bf16.gmra.mrb[8].mxu1 %v868_v9  ;;  %v861_v19 = vmax.f32 %v845_v12, 0.0  ;;  %1766 = vmatprep.subr.bf16.mxu0 %v1849_v3  ;;  %v1851_v9 = vld [vmem:[%s2375_s9 + $0x30] sm:$0xff]   ;;  %v1852_v12 = vld [vmem:[%s2375_s9 + $0x38] sm:$0xff]  }
 0x1a9   : > { %v844_v18 = vadd.f32 %v1614_v32, %v812_v17  ;;  %v859_v21 = vmax.f32 %v843_v14, 0.0  ;;  %1801 = vmatpush3.bf16.msra.mxu1 %v1848_v0 }
 0x1aa   : > { %v862_v20 = vmax.f32 %v846_v16, 0.0  ;;  %1794 = vmatprep.subr.bf16.mxu1 %v1849_v3 }
 0x1ab   : > { %v860_v22 = vmax.f32 %v844_v18, 0.0  ;;  %1767 = vmatpush3.bf16.msra.mxu0 %v1849_v3 }
 0x1ac   : > { %v870_v23 = vpack.c.bf16 %v862_v20, %v861_v19  ;;  %1768 = vmatprep.subr.bf16.mxu0 %v1850_v6 }
 0x1ad   : > { %v869_v24 = vpack.c.bf16 %v860_v22, %v859_v21  ;;  %1802 = vmatpush3.bf16.msra.mxu1 %v1849_v3 }
 0x1ae   : > { %1795 = vmatprep.subr.bf16.mxu1 %v1850_v6 }
 0x1af   : > { %1754 = vmatprep.mubr.bf16.mxu1 %v869_v24  ;;  %1769 = vmatpush3.bf16.msra.mxu0 %v1850_v6 }
 0x1b0   : > { %1755 = vmatmul.mubr.bf16.gmra.mrb[12].mxu1 %v870_v23  ;;  %1770 = vmatprep.subr.bf16.mxu0 %v1851_v9 }
 0x1b1   : > { %1803 = vmatpush3.bf16.msra.mxu1 %v1850_v6 }
 0x1b2   : > { %1796 = vmatprep.subr.bf16.mxu1 %v1851_v9 }
 0x1b3   : > { %1771 = vmatpush3.bf16.msra.mxu0 %v1851_v9 }
 0x1b4   : > { %1772 = vmatprep.subr.bf16.mxu0 %v1852_v12 }
 0x1b5   : > { %1804 = vmatpush3.bf16.msra.mxu1 %v1851_v9 }
 0x1b6   : > { %1797 = vmatprep.subr.bf16.mxu1 %v1852_v12 }
 0x1b7   : > { %1773 = vmatpush3.bf16.msra.mxu0 %v1852_v12 }
 0x1b9   : > { %1805 = vmatpush3.bf16.msra.mxu1 %v1852_v12 }
 0x26b   : > { %v1744_v26 = vpop.f32.mrb[0].mxu1 }
 0x26c   : > { %v2089_v27 = vadd.f32 %v1744_v26, %v2086_v25  ;;  %v976_v28 = vpop.f32.mrb[1].mxu1 }
 0x26d   : > { %v1745_v29 = vpop.f32.mrb[2].mxu1  ;;  %v2096_v32 = vadd.f32 %v2086_v25, %v976_v28 }
 0x26e   : > { %v2092_v30 = vadd.f32 %v1745_v29, %v2086_v25  ;;  %1043 = vadd.xlane.f32.xlu1 %v2089_v27  ;;  %v979_v31 = vpop.f32.mrb[3].mxu1  ;;  %v1089_v36 = vmul.f32 %v2089_v27, %v2089_v27 }
 0x26f   : > { %v2100_v33 = vadd.f32 %v2086_v25, %v979_v31  ;;  %v1087_v41 = vmul.f32 %v2096_v32, %v2096_v32 }
 0x270   : > { %1045 = vadd.xlane.f32.xlu0 %v2092_v30  ;;  %v1090_v39 = vmul.f32 %v2092_v30, %v2092_v30 }
 0x271   : > { %v1088_v42 = vmul.f32 %v2100_v33, %v2100_v33 }
 0x272   : > { %1039 = vadd.xlane.f32.xlu1 %v2096_v32 }
 0x273   : > { %v1748_v34 = vpop.f32.mrb[4].mxu1 }
 0x274   : > { %1041 = vadd.xlane.f32.xlu0 %v2100_v33  ;;  %v992_v35 = vpop.f32.mrb[5].mxu1  ;;  %v2109_v40 = vadd.f32 %v1748_v34, %v2086_v25 }
 0x275   : > { %v1749_v37 = vpop.f32.mrb[6].mxu1  ;;  %v2118_v48 = vadd.f32 %v2086_v25, %v992_v35 }
 0x276   : > { %1107 = vadd.xlane.f32.xlu1 %v1089_v36  ;;  %v995_v38 = vpop.f32.mrb[7].mxu1  ;;  %v1093_v45 = vmul.f32 %v2109_v40, %v2109_v40  ;;  %v2134_v55 = vadd.f32 %v1749_v37, %v2086_v25 }
 0x277   : > { %v2121_v49 = vadd.f32 %v2086_v25, %v995_v38  ;;  %v1091_v52 = vmul.f32 %v2118_v48, %v2118_v48 }
 0x278   : > { %1109 = vadd.xlane.f32.xlu0 %v1090_v39  ;;  %v1094_v59 = vmul.f32 %v2134_v55, %v2134_v55 }
 0x279   : > { %v1092_v62 = vmul.f32 %v2121_v49, %v2121_v49 }
 0x27a   : > { %1103 = vadd.xlane.f32.xlu1 %v1087_v41 }
 0x27b   : > { %v1752_v43 = vpop.f32.mrb[8].mxu1 }
 0x27c   : > { %1105 = vadd.xlane.f32.xlu0 %v1088_v42  ;;  %v1008_v44 = vpop.f32.mrb[9].mxu1  ;;  %v2139_v57 = vadd.f32 %v1752_v43, %v2086_v25 }
 0x27d   : > { %v1753_v46 = vpop.f32.mrb[10].mxu1  ;;  %v2149_v60 = vadd.f32 %v2086_v25, %v1008_v44 }
 0x27e   : > { %1115 = vadd.xlane.f32.xlu1 %v1093_v45  ;;  %v1011_v47 = vpop.f32.mrb[11].mxu1  ;;  %v1097_v63 = vmul.f32 %v2139_v57, %v2139_v57  ;;  %v2163_v1 = vadd.f32 %v1753_v46, %v2086_v25 }
 0x27f   : > { %v1095_v2 = vmul.f32 %v2149_v60, %v2149_v60  ;;  %v2172_v4 = vadd.f32 %v2086_v25, %v1011_v47 }
 0x280   : > { %1051 = vadd.xlane.f32.xlu0 %v2109_v40  ;;  %v1098_v7 = vmul.f32 %v2163_v1, %v2163_v1 }
 0x281   : > { %v1096_v10 = vmul.f32 %v2172_v4, %v2172_v4 }
 0x282   : > { %1049 = vadd.xlane.f32.xlu1 %v2121_v49 }
 0x283   : > { %v1756_v50 = vpop.f32.mrb[12].mxu1 }
 0x284   : > { %1047 = vadd.xlane.f32.xlu0 %v2118_v48  ;;  %v1024_v51 = vpop.f32.mrb[13].mxu1  ;;  %v2175_v5 = vadd.f32 %v1756_v50, %v2086_v25 }
 0x285   : > { %v2131_v54 = vpop.f32.mrb[14].mxu1  ;;  %v2185_v8 = vadd.f32 %v2086_v25, %v1024_v51 }
 0x286   : > { %1111 = vadd.xlane.f32.xlu1 %v1091_v52  ;;  %v2136_v56 = vpop.f32.mrb[15].mxu1  ;;  %v2200_v13 = vadd.f32 %v2131_v54, %v2086_v25  ;;  %v1101_v14 = vmul.f32 %v2175_v5, %v2175_v5 }
 0x287   : > { %v1099_v11 = vmul.f32 %v2185_v8, %v2185_v8  ;;  %v2207_v15 = vadd.f32 %v2086_v25, %v2136_v56 }
 0x288   : > { %1053 = vadd.xlane.f32.xlu0 %v2134_v55  ;;  %v1102_v17 = vmul.f32 %v2200_v13, %v2200_v13 }
 0x289   : > { %v1100_v16 = vmul.f32 %v2207_v15, %v2207_v15 }
 0x28a   : > { %1059 = vadd.xlane.f32.xlu1 %v2139_v57 }
 0x28c   : > { %1117 = vadd.xlane.f32.xlu0 %v1094_v59 }
 0x28e   : > { %1055 = vadd.xlane.f32.xlu1 %v2149_v60 }
 0x290   : > { %1113 = vadd.xlane.f32.xlu0 %v1092_v62 }
 0x292   : > { %1123 = vadd.xlane.f32.xlu1 %v1097_v63 }
 0x294   : > { %1061 = vadd.xlane.f32.xlu0 %v2163_v1 }
 0x296   : > { %1119 = vadd.xlane.f32.xlu1 %v1095_v2 }
 0x298   : > { %1057 = vadd.xlane.f32.xlu0 %v2172_v4 }
 0x29a   : > { %1067 = vadd.xlane.f32.xlu1 %v2175_v5 }
 0x29c   : > { %1125 = vadd.xlane.f32.xlu0 %v1098_v7 }
 0x29e   : > { %1063 = vadd.xlane.f32.xlu1 %v2185_v8 }
 0x2a0   : > { %1121 = vadd.xlane.f32.xlu0 %v1096_v10 }
 0x2a2   : > { %1127 = vadd.xlane.f32.xlu1 %v1099_v11 }
 0x2a4   : > { %1069 = vadd.xlane.f32.xlu0 %v2200_v13 }
 0x2a6   : > { %1131 = vadd.xlane.f32.xlu1 %v1101_v14 }
 0x2a8   : > { %1065 = vadd.xlane.f32.xlu0 %v2207_v15 }
 0x2ac   : > { %1129 = vadd.xlane.f32.xlu0 %v1100_v16 }
 0x2b0   : > { %1133 = vadd.xlane.f32.xlu0 %v1102_v17 }
 0x2fb   : > { %v1044_v18 = vpop.xlane.xlu1 %1043 }
 0x2fc   : > { %v1073_v21 = vmul.f32 0.0078125, %v1044_v18 }
 0x2fd   : > { %v1046_v19 = vpop.xlane.xlu0 %1045 }
 0x2fe   : > { %v1074_v23 = vmul.f32 0.0078125, %v1046_v19  ;;  %v1153_v25 = vmul.f32 %v1073_v21, %v1073_v21  ;;  %v1217_v3 = vsub.f32 %v2089_v27, %v1073_v21  ;;  %v2230_v27 = vld [vmem:[%s2373_s7] ss:$0 sm:$0xff] }
 0x2ff   : > { %v1040_v20 = vpop.xlane.xlu1 %1039 }
 0x300   : > { %v1071_v26 = vmul.f32 0.0078125, %v1040_v20  ;;  %v1154_v34 = vmul.f32 %v1074_v23, %v1074_v23  ;;  %v1218_v9 = vsub.f32 %v2092_v30, %v1074_v23 }
 0x301   : > { %v1042_v22 = vpop.xlane.xlu0 %1041 }
 0x302   : > { %v1072_v29 = vmul.f32 0.0078125, %v1042_v22  ;;  %v1151_v38 = vmul.f32 %v1071_v26, %v1071_v26  ;;  %v1215_v18 = vsub.f32 %v2096_v32, %v1071_v26 }
 0x303   : > { %v1108_v24 = vpop.xlane.xlu1 %1107 }
 0x304   : > { %v1137_v28 = vmul.f32 0.0078125, %v1108_v24  ;;  %v1152_v43 = vmul.f32 %v1072_v29, %v1072_v29  ;;  %v1216_v30 = vsub.f32 %v2100_v33, %v1072_v29 }
 0x305   : > { %v1110_v31 = vpop.xlane.xlu0 %1109 }
 0x306   : > { %v1169_v35 = vsub.f32 %v1137_v28, %v1153_v25  ;;  %v1138_v36 = vmul.f32 0.0078125, %v1110_v31 }
 0x307   : > { %v1104_v37 = vpop.xlane.xlu1 %1103 }
 0x308   : > { %v1185_v39 = vadd.f32 1e-05, %v1169_v35  ;;  %v1170_v41 = vsub.f32 %v1138_v36, %v1154_v34  ;;  %v1135_v42 = vmul.f32 0.0078125, %v1104_v37  ;;  %v2242_v36 = vld [vmem:[%s2374_s8] ss:$0 sm:$0xff] }
 0x309   : > { %v1106_v44 = vpop.xlane.xlu0 %1105 }
 0x30a   : > { %1853 = vrsqrt.f32 %v1185_v39  ;;  %v1186_v45 = vadd.f32 1e-05, %v1170_v41  ;;  %v1167_v46 = vsub.f32 %v1135_v42, %v1151_v38  ;;  %v1136_v47 = vmul.f32 0.0078125, %v1106_v44 }
 0x30b   : > { %v1116_v50 = vpop.xlane.xlu1 %1115 }
 0x30c   : > { %1855 = vrsqrt.f32 %v1186_v45  ;;  %v1183_v51 = vadd.f32 1e-05, %v1167_v46  ;;  %v1168_v52 = vsub.f32 %v1136_v47, %v1152_v43  ;;  %v1141_v63 = vmul.f32 0.0078125, %v1116_v50 }
 0x30d   : > { %v1052_v53 = vpop.xlane.xlu0 %1051 }
 0x30e   : > { %1857 = vrsqrt.f32 %v1183_v51  ;;  %v1184_v54 = vadd.f32 1e-05, %v1168_v52  ;;  %v2214_v56 = vmul.f32 0.0078125, %v1052_v53 }
 0x30f   : > { %v1050_v58 = vpop.xlane.xlu1 %1049 }
 0x310   : > { %1859 = vrsqrt.f32 %v1184_v54  ;;  %v1157_v59 = vmul.f32 %v2214_v56, %v2214_v56  ;;  %v2234_v34 = vmul.f32 0.0078125, %v1050_v58 }
 0x311   : > { %v1048_v61 = vpop.xlane.xlu0 %1047 }
 0x312   : > { %v2218_v62 = vmul.f32 0.0078125, %v1048_v61  ;;  %v1173_v10 = vsub.f32 %v1141_v63, %v1157_v59  ;;  %v1156_v44 = vmul.f32 %v2234_v34, %v2234_v34 }
 0x313   : > { %v1112_v0 = vpop.xlane.xlu1 %1111 }
 0x314   : > { %v1854_v2 = vpop.eup %1853  ;;  %v1155_v6 = vmul.f32 %v2218_v62, %v2218_v62  ;;  %v1139_v7 = vmul.f32 0.0078125, %v1112_v0  ;;  %v1189_v23 = vadd.f32 1e-05, %v1173_v10 }
 0x315   : > { %v1054_v11 = vpop.xlane.xlu0 %1053  ;;  %v1233_v14 = vmul.f32 %v1854_v2, %v1217_v3 }
 0x316   : > { %v1856_v12 = vpop.eup %1855  ;;  %v1171_v16 = vsub.f32 %v1139_v7, %v1155_v6  ;;  %v2224_v17 = vmul.f32 0.0078125, %v1054_v11 }
 0x317   : > { %v1234_v19 = vmul.f32 %v1856_v12, %v1218_v9  ;;  %v1060_v20 = vpop.xlane.xlu1 %1059  ;;  %v1256_v35 = vmul.f32 %v2230_v27, %v1233_v14 }
 0x318   : > { %v1858_v21 = vpop.eup %1857  ;;  %v1187_v22 = vadd.f32 1e-05, %v1171_v16  ;;  %v1158_v32 = vmul.f32 %v2224_v17, %v2224_v17  ;;  %v2251_v50 = vmul.f32 0.0078125, %v1060_v20 }
 0x319   : > { %v1118_v24 = vpop.xlane.xlu0 %1117  ;;  %v1231_v25 = vmul.f32 %v1858_v21, %v1215_v18  ;;  %v1257_v28 = vmul.f32 %v2230_v27, %v1234_v19  ;;  %v1279_v47 = vadd.f32 %v2242_v36, %v1256_v35  ;;  %v1219_v21 = vsub.f32 %v2118_v48, %v2218_v62 }
 0x31a   : > { %v1860_v31 = vpop.eup %1859  ;;  %v1142_v26 = vmul.f32 0.0078125, %v1118_v24  ;;  %1861 = vrsqrt.f32 %v1187_v22  ;;  %v1161_v6 = vmul.f32 %v2251_v50, %v2251_v50  ;;  %v1222_v24 = vsub.f32 %v2134_v55, %v2224_v17 }
 0x31b   : > { %v1056_v33 = vpop.xlane.xlu1 %1055  ;;  %v1232_v29 = vmul.f32 %v1860_v31, %v1216_v30  ;;  %v1254_v37 = vmul.f32 %v2230_v27, %v1231_v25  ;;  %v1280_v39 = vadd.f32 %v2242_v36, %v1257_v28  ;;  %1863 = vrsqrt.f32 %v1189_v23 }
 0x31c   : > { %v1174_v38 = vsub.f32 %v1142_v26, %v1158_v32  ;;  %v2254_v58 = vmul.f32 0.0078125, %v1056_v33  ;;  %v1295_v3 = vmax.f32 %v1279_v47, 0.0  ;;  %v1221_v23 = vsub.f32 %v2109_v40, %v2214_v56 }
 0x31d   : > { %v1114_v41 = vpop.xlane.xlu0 %1113  ;;  %v1255_v42 = vmul.f32 %v2230_v27, %v1232_v29  ;;  %v1277_v43 = vadd.f32 %v2242_v36, %v1254_v37  ;;  %v1296_v54 = vmax.f32 %v1280_v39, 0.0  ;;  %v1220_v55 = vsub.f32 %v2121_v49, %v2234_v34 }
 0x31e   : > { %v1190_v45 = vadd.f32 1e-05, %v1174_v38  ;;  %v1140_v46 = vmul.f32 0.0078125, %v1114_v41  ;;  %v1159_v11 = vmul.f32 %v2254_v58, %v2254_v58 }
 0x31f   : > { %v1124_v51 = vpop.xlane.xlu1 %1123  ;;  %v1278_v52 = vadd.f32 %v2242_v36, %v1255_v42  ;;  %v1293_v63 = vmax.f32 %v1277_v43, 0.0  ;;  %v1310_v10 = vpack.c.bf16 %v1296_v54, %v1295_v3 }
 0x320   : > { %1865 = vrsqrt.f32 %v1190_v45  ;;  %v1172_v53 = vsub.f32 %v1140_v46, %v1156_v44  ;;  %v1145_v59 = vmul.f32 0.0078125, %v1124_v51 }
 0x321   : > { %v1062_v61 = vpop.xlane.xlu0 %1061  ;;  %v1294_v0 = vmax.f32 %v1278_v52, 0.0 }
 0x322   : > { %v1188_v2 = vadd.f32 1e-05, %v1172_v53  ;;  %v1177_v12 = vsub.f32 %v1145_v59, %v1161_v6  ;;  %v2260_v19 = vmul.f32 0.0078125, %v1062_v61 }
 0x323   : > { %v1120_v7 = vpop.xlane.xlu1 %1119  ;;  %v1309_v9 = vpack.c.bf16 %v1294_v0, %v1293_v63 }
 0x324   : > { %1867 = vrsqrt.f32 %v1188_v2  ;;  %v1143_v14 = vmul.f32 0.0078125, %v1120_v7  ;;  %v1862_v18 = vpop.eup %1861  ;;  %v1193_v25 = vadd.f32 1e-05, %v1177_v12  ;;  %v1162_v33 = vmul.f32 %v2260_v19, %v2260_v19 }
 0x325   : > { %1774 = vmatprep.mubr.bf16.mxu0 %v1309_v9  ;;  %v1058_v16 = vpop.xlane.xlu0 %1057  ;;  %v1864_v20 = vpop.eup %1863  ;;  %v1235_v32 = vmul.f32 %v1862_v18, %v1219_v21 }
 0x326   : > { %1775 = vmatmul.mubr.bf16.vlgmr.msra.gmra.mrb[16].mxu0 %v1310_v10  ;;  %v1175_v22 = vsub.f32 %v1143_v14, %v1159_v11  ;;  %v1237_v35 = vmul.f32 %v1864_v20, %v1221_v23  ;;  %v2270_v29 = vmul.f32 0.0078125, %v1058_v16 }
 0x327   : > { %v1068_v30 = vpop.xlane.xlu1 %1067  ;;  %v1258_v17 = vmul.f32 %v2230_v27, %v1235_v32 }
 0x328   : > { %v1191_v28 = vadd.f32 1e-05, %v1175_v22  ;;  %v1260_v42 = vmul.f32 %v2230_v27, %v1237_v35  ;;  %v1160_v43 = vmul.f32 %v2270_v29, %v2270_v29  ;;  %v2284_v53 = vmul.f32 0.0078125, %v1068_v30 }
 0x329   : > { %v1126_v31 = vpop.xlane.xlu0 %1125  ;;  %v1281_v61 = vadd.f32 %v2242_v36, %v1258_v17  ;;  %v1223_v30 = vsub.f32 %v2149_v60, %v2254_v58 }
 0x32a   : > { %v1866_v26 = vpop.eup %1865  ;;  %v1146_v48 = vmul.f32 0.0078125, %v1126_v31  ;;  %1869 = vrsqrt.f32 %v1191_v28  ;;  %v1283_v63 = vadd.f32 %v2242_v36, %v1260_v42  ;;  %v1165_v10 = vmul.f32 %v2284_v53, %v2284_v53 }
 0x32b   : > { %v1238_v62 = vmul.f32 %v1866_v26, %v1222_v24  ;;  %v1064_v37 = vpop.xlane.xlu1 %1063  ;;  %1871 = vrsqrt.f32 %v1193_v25  ;;  %v1297_v14 = vmax.f32 %v1281_v61, 0.0  ;;  %v1225_v25 = vsub.f32 %v2139_v57, %v2251_v50 }
 0x32c   : > { %v1178_v38 = vsub.f32 %v1146_v48, %v1162_v33  ;;  %v2272_v40 = vmul.f32 0.0078125, %v1064_v37  ;;  %v1299_v20 = vmax.f32 %v1283_v63, 0.0  ;;  %v1226_v31 = vsub.f32 %v2163_v1, %v2260_v19 }
 0x32d   : > { %v1122_v56 = vpop.xlane.xlu0 %1121  ;;  %v1261_v39 = vmul.f32 %v2230_v27, %v1238_v62  ;;  %v1224_v57 = vsub.f32 %v2172_v4, %v2270_v29 }
 0x32e   : > { %v1868_v41 = vpop.eup %1867  ;;  %v1194_v44 = vadd.f32 1e-05, %v1178_v38  ;;  %v1144_v45 = vmul.f32 0.0078125, %v1122_v56  ;;  %v1163_v46 = vmul.f32 %v2272_v40, %v2272_v40 }
 0x32f   : > { %v1128_v47 = vpop.xlane.xlu1 %1127  ;;  %v1236_v51 = vmul.f32 %v1868_v41, %v1220_v55  ;;  %v1284_v52 = vadd.f32 %v2242_v36, %v1261_v39 }
 0x330   : > { %1873 = vrsqrt.f32 %v1194_v44  ;;  %v1176_v49 = vsub.f32 %v1144_v45, %v1160_v43  ;;  %v1147_v34 = vmul.f32 0.0078125, %v1128_v47 }
 0x331   : > { %v1070_v54 = vpop.xlane.xlu0 %1069  ;;  %v1259_v59 = vmul.f32 %v2230_v27, %v1236_v51  ;;  %v1300_v9 = vmax.f32 %v1284_v52, 0.0  ;;  %v1227_v51 = vsub.f32 %v2185_v8, %v2272_v40 }
 0x332   : > { %v1192_v0 = vadd.f32 1e-05, %v1176_v49  ;;  %v1179_v2 = vsub.f32 %v1147_v34, %v1163_v46  ;;  %v1086_v48 = vmul.f32 0.0078125, %v1070_v54 }
 0x333   : > { %v1132_v3 = vpop.xlane.xlu1 %1131  ;;  %v1282_v6 = vadd.f32 %v2242_v36, %v1259_v59  ;;  %v1312_v28 = vpack.c.bf16 %v1300_v9, %v1299_v20 }
 0x334   : > { %1875 = vrsqrt.f32 %v1192_v0  ;;  %v1195_v7 = vadd.f32 1e-05, %v1179_v2  ;;  %v1149_v11 = vmul.f32 0.0078125, %v1132_v3  ;;  %v1870_v18 = vpop.eup %1869  ;;  %v1166_v56 = vmul.f32 %v1086_v48, %v1086_v48 }
 0x335   : > { %v1066_v12 = vpop.xlane.xlu0 %1065  ;;  %v1298_v16 = vmax.f32 %v1282_v6, 0.0  ;;  %v1872_v22 = vpop.eup %1871  ;;  %v1239_v35 = vmul.f32 %v1870_v18, %v1223_v30  ;;  %v1229_v0 = vsub.f32 %v2175_v5, %v2284_v53 }
 0x336   : > { %v1084_v21 = vmul.f32 0.0078125, %v1066_v12  ;;  %v1181_v23 = vsub.f32 %v1149_v11, %v1165_v10  ;;  %1877 = vrsqrt.f32 %v1195_v7  ;;  %v1241_v60 = vmul.f32 %v1872_v22, %v1225_v25  ;;  %v1626_v25 = vld [vmem:[%s2376_s10] ss:$0 sm:$0xff] }
 0x337   : > { %v1311_v24 = vpack.c.bf16 %v1298_v16, %v1297_v14  ;;  %v1262_v55 = vmul.f32 %v2230_v27, %v1239_v35  ;;  %v1230_v10 = vsub.f32 %v2200_v13, %v1086_v48 }
 0x338   : > { %v1197_v32 = vadd.f32 1e-05, %v1181_v23  ;;  %v1164_v62 = vmul.f32 %v1084_v21, %v1084_v21  ;;  %v1264_v41 = vmul.f32 %v2230_v27, %v1241_v60  ;;  %v1228_v6 = vsub.f32 %v2207_v15, %v1084_v21 }
 0x339   : > { %1778 = vmatprep.mubr.bf16.mxu1 %v1311_v24  ;;  %v1130_v26 = vpop.xlane.xlu0 %1129  ;;  %v1285_v4 = vadd.f32 %v2242_v36, %v1262_v55 }
 0x33a   : > { %v1874_v33 = vpop.eup %1873  ;;  %v1148_v37 = vmul.f32 0.0078125, %v1130_v26  ;;  %1779 = vmatmul.mubr.bf16.vlgmr.msra.gmra.mrb[16].mxu1 %v1312_v28  ;;  %1879 = vrsqrt.f32 %v1197_v32  ;;  %v1287_v47 = vadd.f32 %v2242_v36, %v1264_v41 }
 0x33b   : > { %v1242_v58 = vmul.f32 %v1874_v33, %v1226_v31  ;;  %v1301_v52 = vmax.f32 %v1285_v4, 0.0 }
 0x33c   : > { %v1180_v38 = vsub.f32 %v1148_v37, %v1164_v62  ;;  %v1303_v63 = vmax.f32 %v1287_v47, 0.0 }
 0x33d   : > { %v1134_v50 = vpop.xlane.xlu0 %1133  ;;  %v1265_v1 = vmul.f32 %v2230_v27, %v1242_v58 }
 0x33e   : > { %v1876_v19 = vpop.eup %1875  ;;  %v1196_v17 = vadd.f32 1e-05, %v1180_v38  ;;  %v1150_v39 = vmul.f32 0.0078125, %v1134_v50 }
 0x33f   : > { %v1240_v42 = vmul.f32 %v1876_v19, %v1224_v57  ;;  %v1288_v44 = vadd.f32 %v2242_v36, %v1265_v1 }
 0x340   : > { %1881 = vrsqrt.f32 %v1196_v17  ;;  %v1182_v43 = vsub.f32 %v1150_v39, %v1166_v56  ;;  %v1878_v29 = vpop.eup %1877 }
 0x341   : > { %v1263_v45 = vmul.f32 %v2230_v27, %v1240_v42  ;;  %v1304_v34 = vmax.f32 %v1288_v44, 0.0  ;;  %v1243_v59 = vmul.f32 %v1878_v29, %v1227_v51 }
 0x342   : > { %v1198_v46 = vadd.f32 1e-05, %v1182_v43 }
 0x343   : > { %v1286_v49 = vadd.f32 %v2242_v36, %v1263_v45  ;;  %v1314_v3 = vpack.c.bf16 %v1304_v34, %v1303_v63  ;;  %v1266_v7 = vmul.f32 %v2230_v27, %v1243_v59 }
 0x344   : > { %1883 = vrsqrt.f32 %v1198_v46  ;;  %v1880_v61 = vpop.eup %1879 }
 0x345   : > { %v1302_v54 = vmax.f32 %v1286_v49, 0.0  ;;  %v1245_v8 = vmul.f32 %v1880_v61, %v1229_v0  ;;  %v1289_v12 = vadd.f32 %v2242_v36, %v1266_v7 }
 0x347   : > { %v1313_v2 = vpack.c.bf16 %v1302_v54, %v1301_v52  ;;  %v1268_v14 = vmul.f32 %v2230_v27, %v1245_v8  ;;  %v1305_v16 = vmax.f32 %v1289_v12, 0.0 }
 0x349   : > { %1782 = vmatprep.mubr.bf16.mxu1 %v1313_v2  ;;  %v1291_v21 = vadd.f32 %v2242_v36, %v1268_v14 }
 0x34a   : > { %v1882_v40 = vpop.eup %1881  ;;  %1783 = vmatmul.mubr.bf16.gmra.mrb[20].mxu1 %v1314_v3 }
 0x34b   : > { %v1244_v9 = vmul.f32 %v1882_v40, %v1228_v6  ;;  %v1307_v30 = vmax.f32 %v1291_v21, 0.0 }
 0x34d   : > { %v1267_v11 = vmul.f32 %v2230_v27, %v1244_v9 }
 0x34e   : > { %v1884_v5 = vpop.eup %1883 }
 0x34f   : > { %v1290_v53 = vadd.f32 %v2242_v36, %v1267_v11  ;;  %v1246_v15 = vmul.f32 %v1884_v5, %v1230_v10 }
 0x351   : > { %v1306_v18 = vmax.f32 %v1290_v53, 0.0  ;;  %v1269_v20 = vmul.f32 %v2230_v27, %v1246_v15 }
 0x353   : > { %v1315_v22 = vpack.c.bf16 %v1306_v18, %v1305_v16  ;;  %v1292_v13 = vadd.f32 %v2242_v36, %v1269_v20 }
 0x355   : > { %1786 = vmatprep.mubr.bf16.mxu1 %v1315_v22  ;;  %v1308_v23 = vmax.f32 %v1292_v13, 0.0 }
 0x357   : > { %v1316_v24 = vpack.c.bf16 %v1308_v23, %v1307_v30 }
 0x359   : > { %1787 = vmatmul.mubr.bf16.gmra.mrb[24].mxu1 %v1316_v24 }
 0x3f9   : > { %v1776_v27 = vpop.f32.mrb[16].mxu0 }
 0x3fa   : > { %v1431_v36 = vadd.f32 %v1776_v27, %v1626_v25  ;;  %v1422_v28 = vpop.f32.mrb[17].mxu0 }
 0x3fb   : > { %v1423_v31 = vadd.f32 %v1626_v25, %v1422_v28  ;;  %v1777_v32 = vpop.f32.mrb[18].mxu0 }
 0x3fc   : > { %1487 = vst.msk [vmem:[%s2329_s26 + $0x10] sm:$0xff] %vm702_vm2, %v1431_v36  ;;  %v1434_v26 = vadd.f32 %v1777_v32, %v1626_v25  ;;  %v1425_v35 = vpop.f32.mrb[19].mxu0 }
 0x3fd   : > { %1485 = vst.msk [vmem:[%s2329_s26] sm:$0xff] %vm702_vm2, %v1423_v31  ;;  %v1426_v33 = vadd.f32 %v1626_v25, %v1425_v35 }
 0x3fe   : > { %1488 = vst.msk [vmem:[%s2329_s26 + $0x18] sm:$0xff] %vm702_vm2, %v1434_v26 }
 0x3ff   : > { %1486 = vst.msk [vmem:[%s2329_s26 + $0x8] sm:$0xff] %vm702_vm2, %v1426_v33 }
 0x40d   : > { %v1780_v48 = vpop.f32.mrb[16].mxu1 }
 0x40e   : > { %v1447_v62 = vadd.f32 %v1780_v48, %v1626_v25  ;;  %v1438_v37 = vpop.f32.mrb[17].mxu1 }
 0x40f   : > { %v1439_v60 = vadd.f32 %v1626_v25, %v1438_v37  ;;  %v1781_v58 = vpop.f32.mrb[18].mxu1 }
 0x410   : > { %1491 = vst.msk [vmem:[%s2329_s26 + $0x30] sm:$0xff] %vm702_vm2, %v1447_v62  ;;  %v1450_v38 = vadd.f32 %v1781_v58, %v1626_v25  ;;  %v1441_v57 = vpop.f32.mrb[19].mxu1 }
 0x411   : > { %1489 = vst.msk [vmem:[%s2329_s26 + $0x20] sm:$0xff] %vm702_vm2, %v1439_v60  ;;  %v1442_v50 = vadd.f32 %v1626_v25, %v1441_v57 }
 0x412   : > { %1492 = vst.msk [vmem:[%s2329_s26 + $0x38] sm:$0xff] %vm702_vm2, %v1450_v38 }
 0x413   : > { %1490 = vst.msk [vmem:[%s2329_s26 + $0x28] sm:$0xff] %vm702_vm2, %v1442_v50 }
 0x41d   : > { %v1784_v55 = vpop.f32.mrb[20].mxu1 }
 0x41e   : > { %v1463_v1 = vadd.f32 %v1784_v55, %v1626_v25  ;;  %v1454_v19 = vpop.f32.mrb[21].mxu1 }
 0x41f   : > { %v1455_v56 = vadd.f32 %v1626_v25, %v1454_v19  ;;  %v1785_v17 = vpop.f32.mrb[22].mxu1 }
 0x420   : > { %1495 = vst.msk [vmem:[%s2329_s26 + $0x50] sm:$0xff] %vm702_vm2, %v1463_v1  ;;  %v1466_v39 = vadd.f32 %v1785_v17, %v1626_v25  ;;  %v1457_v41 = vpop.f32.mrb[23].mxu1 }
 0x421   : > { %1493 = vst.msk [vmem:[%s2329_s26 + $0x40] sm:$0xff] %vm702_vm2, %v1455_v56  ;;  %v1458_v42 = vadd.f32 %v1626_v25, %v1457_v41 }
 0x422   : > { %1496 = vst.msk [vmem:[%s2329_s26 + $0x58] sm:$0xff] %vm702_vm2, %v1466_v39 }
 0x423   : > { %1494 = vst.msk [vmem:[%s2329_s26 + $0x48] sm:$0xff] %vm702_vm2, %v1458_v42 }
 0x42c   : > { %v1788_v43 = vpop.f32.mrb[24].mxu1 }
 0x42d   : > { %v1479_v44 = vadd.f32 %v1788_v43, %v1626_v25  ;;  %v1470_v45 = vpop.f32.mrb[25].mxu1 }
 0x42e   : > { %v1471_v4 = vadd.f32 %v1626_v25, %v1470_v45  ;;  %v1789_v29 = vpop.f32.mrb[26].mxu1 }
 0x42f   : > { %1499 = vst.msk [vmem:[%s2329_s26 + $0x70] sm:$0xff] %vm702_vm2, %v1479_v44  ;;  %v1482_v46 = vadd.f32 %v1789_v29, %v1626_v25  ;;  %v1473_v47 = vpop.f32.mrb[27].mxu1 }
 0x430   : > { %1497 = vst.msk [vmem:[%s2329_s26 + $0x60] sm:$0xff] %vm702_vm2, %v1471_v4  ;;  %v1474_v51 = vadd.f32 %v1626_v25, %v1473_v47 }
 0x431   : > { %1500 = vst.msk [vmem:[%s2329_s26 + $0x78] sm:$0xff] %vm702_vm2, %v1482_v46 }
 0x432   : > { %1498 = vst.msk [vmem:[%s2329_s26 + $0x68] sm:$0xff] %vm702_vm2, %v1474_v51 }
 0x433 PF: > { %s21_s17 = sadd.s32 1, %s1891_s17  }
 0x434   : > { %p18_p4 = scmp.ge.s32.totalorder %s21_s17, 4  }
 0x436   :  { %20 = sbr.rel (!%p18_p4) target bundleno = 1 (0x1), region = 97 }

</bundles_post_ra>
